<compile_context>
chip_gen: v7x
topology: tpu7x:2x2x1
jax: 0.10.0
libtpu: 0.0.40
codegen_flags: <defaults>
</compile_context>

<pallas_src>
import functools

import jax
import jax.numpy as jnp
from jax.experimental import pallas as pl
from jax.experimental.pallas import tpu as pltpu

BN_EPS = 1e-5
LANE = 128                        # pad K and C_out to a multiple of the lane width
VMEM_LIMIT = 48 * 1024 * 1024     # explicit scoped-VMEM cap: < v7x 64 MiB/TC, fine on v5e/v6e
VMEM_TILE_BUDGET = 20 * 1024 * 1024  # working-set budget used to size TILE_M


def _round_up(x, n):
    return -(-x // n) * n


def _pick_tile_m(m, k_pad, c_pad):
    """Largest M tile (<=1024 rows) whose double-buffered working set fits the VMEM
    budget; reduced so the 'parallel' grid has >= 2 steps when possible (feeds both
    v7x TensorCores); never wider than the (8-aligned) true M."""
    per_row = 2 * (k_pad * 2 + c_pad * 2 + c_pad * 4)  # bf16 patches + bf16 conv + f32 out, x2 bufs
    resident = 2 * k_pad * c_pad * 2                   # weight block (double-buffered)
    tile = 1024
    while tile > 256 and tile * per_row + resident > VMEM_TILE_BUDGET:
        tile //= 2
    while tile > 256 and -(-m // tile) < 2:            # keep num_tiles >= 2 for megacore
        tile //= 2
    return min(tile, _round_up(m, 8))


# ---------------------------------------------------------------------------
# Kernels
# ---------------------------------------------------------------------------

def _tile_channel_stats(acc, tile_m, m_total):
    """Per-tile channel sum (row 0) and centered sum-of-squares (row 1), with the
    zero-padded rows beyond the true M masked out of the centered term."""
    i = pl.program_id(0)
    # Padded patch rows are exactly zero, so the plain sum is already correct.
    s = jnp.sum(acc, axis=0, keepdims=True)                       # (1, C)
    n = jnp.maximum(jnp.minimum(m_total - i * tile_m, tile_m), 1).astype(jnp.float32)
    row = jax.lax.broadcasted_iota(jnp.int32, (acc.shape[0], 1), 0)
    valid = (row + i * tile_m) < m_total                          # (T, 1)
    centered = jnp.where(valid, acc - s / n, 0.0)
    css = jnp.sum(centered * centered, axis=0, keepdims=True)     # (1, C)
    rsel = jax.lax.broadcasted_iota(jnp.int32, (8, acc.shape[1]), 0)
    stats = jnp.where(rsel == 0, s, 0.0) + jnp.where(rsel == 1, css, 0.0)
    return stats[None]                                            # (1, 8, C)


def _conv_stats_store_kernel(p_ref, w_ref, conv_ref, stats_ref, *, tile_m, m_total):
    # Pass 1 (K_pad >= C_pad): matmul, store bf16 conv tile, emit partial stats.
    acc = jnp.dot(p_ref[...], w_ref[...], preferred_element_type=jnp.float32)
    conv_ref[...] = acc.astype(jnp.bfloat16)                      # lane-dense bf16 store
    stats_ref[...] = _tile_channel_stats(acc, tile_m, m_total)


def _stats_only_kernel(p_ref, w_ref, stats_ref, *, tile_m, m_total):
    # Pass 1 (K_pad < C_pad): matmul for statistics only (conv recomputed in pass 2).
    acc = jnp.dot(p_ref[...], w_ref[...], preferred_element_type=jnp.float32)
    stats_ref[...] = _tile_channel_stats(acc, tile_m, m_total)


def _bn_relu_kernel(conv_ref, scale_ref, shift_ref, o_ref):
    # Pass 2 (stored conv): pure elementwise fused BN affine + ReLU.
    y = conv_ref[...].astype(jnp.float32) * scale_ref[...] + shift_ref[...]
    o_ref[...] = jnp.maximum(y, 0.0).astype(o_ref.dtype)          # lane-dense store


def _matmul_bn_relu_kernel(p_ref, w_ref, scale_ref, shift_ref, o_ref):
    # Pass 2 (recompute): conv tile on the MXU, then fused BN affine + ReLU.
    acc = jnp.dot(p_ref[...], w_ref[...], preferred_element_type=jnp.float32)
    y = acc * scale_ref[...] + shift_ref[...]
    o_ref[...] = jnp.maximum(y, 0.0).astype(o_ref.dtype)


# ---------------------------------------------------------------------------
# Host-side glue
# ---------------------------------------------------------------------------

def _im2col(x_nchw, kh, kw, stride, padding, dilation):
    """Extract conv patches. Returns (N*Ho*Wo, C_in*kh*kw) in x's dtype, and (Ho, Wo)."""
    n, c_in, h, w = x_nchw.shape
    xp = jnp.pad(x_nchw, ((0, 0), (0, 0), (padding, padding), (padding, padding)))
    ho = (h + 2 * padding - dilation * (kh - 1) - 1) // stride + 1
    wo = (w + 2 * padding - dilation * (kw - 1) - 1) // stride + 1
    cols = []
    for ki in range(kh):
        for kj in range(kw):
            sl = xp[:, :,
                    ki * dilation: ki * dilation + (ho - 1) * stride + 1: stride,
                    kj * dilation: kj * dilation + (wo - 1) * stride + 1: stride]
            cols.append(sl)                                       # (N, C_in, Ho, Wo)
    patches = jnp.stack(cols, axis=2)                             # (N, C_in, kh*kw, Ho, Wo)
    patches = patches.transpose(0, 3, 4, 1, 2).reshape(n * ho * wo, c_in * kh * kw)
    return patches, ho, wo


@functools.partial(jax.jit,
                   static_argnames=("stride", "padding", "dilation", "out_layout", "out_dtype"))
def conv_bn_relu(x_nchw, weight, gamma, beta, *, stride, padding, dilation,
                 out_layout="NCHW", out_dtype=jnp.float32):
    """Forward of ConvBNReLU.  x: (N, C_in, H, W) f32; weight: (C_out, C_in, kh, kw)."""
    assert out_layout in ("NCHW", "NHWC")
    n = x_nchw.shape[0]
    c_out, c_in, kh, kw = weight.shape

    # bf16 BEFORE im2col: the patch matrix is the largest HBM buffer of the op.
    patches, ho, wo = _im2col(x_nchw.astype(jnp.bfloat16), kh, kw, stride, padding, dilation)
    m, k = patches.shape

    k_pad = _round_up(k, LANE)
    c_pad = _round_up(c_out, LANE)
    tile_m = _pick_tile_m(m, k_pad, c_pad)
    m_pad = _round_up(m, tile_m)
    num_tiles = m_pad // tile_m

    p = jnp.pad(patches, ((0, m_pad - m), (0, k_pad - k)))        # bf16, zero-padded
    w_mat = jnp.pad(weight.reshape(c_out, k).T.astype(jnp.bfloat16),
                    ((0, k_pad - k), (0, c_pad - c_out)))

    cp = pltpu.CompilerParams(dimension_semantics=("parallel",),
                              vmem_limit_bytes=VMEM_LIMIT)

    p_spec = pl.BlockSpec((tile_m, k_pad), lambda i: (i, 0))
    w_spec = pl.BlockSpec((k_pad, c_pad), lambda i: (0, 0))
    vec_spec = pl.BlockSpec((1, c_pad), lambda i: (0, 0))
    row_spec = pl.BlockSpec((tile_m, c_pad), lambda i: (i, 0))
    stats_spec = pl.BlockSpec((1, 8, c_pad), lambda i: (i, 0, 0))
    stats_shape = jax.ShapeDtypeStruct((num_tiles, 8, c_pad), jnp.float32)

    # Shape gate (perf review): storing the bf16 conv beats re-reading the patch
    # matrix iff K_pad >= C_pad; it also halves the MXU work (matters on v5e).
    store_conv = k_pad >= c_pad

    # ---- Pass 1: tiled matmul + per-tile (sum, centered sum-of-squares) ----
    if store_conv:
        conv_flat, stats = pl.pallas_call(
            functools.partial(_conv_stats_store_kernel, tile_m=tile_m, m_total=m),
            out_shape=(jax.ShapeDtypeStruct((m_pad, c_pad), jnp.bfloat16), stats_shape),
            grid=(num_tiles,),
            in_specs=[p_spec, w_spec],
            out_specs=(row_spec, stats_spec),
            compiler_params=cp,
        )(p, w_mat)
    else:
        conv_flat = None
        stats = pl.pallas_call(
            functools.partial(_stats_only_kernel, tile_m=tile_m, m_total=m),
            out_shape=stats_shape,
            grid=(num_tiles,),
            in_specs=[p_spec, w_spec],
            out_specs=stats_spec,
            compiler_params=cp,
        )(p, w_mat)

    # ---- Glue: Chan-combine per-tile partials into global (biased) batch stats ----
    sums = stats[:, 0, :]                                         # (num_tiles, C_pad)
    css = stats[:, 1, :]                                          # centered sum-of-squares
    counts = jnp.clip(m - jnp.arange(num_tiles) * tile_m, 1, tile_m
                      ).astype(jnp.float32)[:, None]              # valid rows per tile
    mean = jnp.sum(sums, axis=0) / m
    tile_mean = sums / counts
    m2 = jnp.sum(css, axis=0) + jnp.sum(counts * (tile_mean - mean) ** 2, axis=0)
    var = m2 / m                                                  # biased, as PyTorch BN
    g = jnp.pad(gamma.astype(jnp.float32), (0, c_pad - c_out))
    b = jnp.pad(beta.astype(jnp.float32), (0, c_pad - c_out))
    scale = (g * jax.lax.rsqrt(var + BN_EPS)).reshape(1, c_pad)
    shift = (b - mean * scale[0]).reshape(1, c_pad)

    # ---- Pass 2: fused affine + ReLU (lane-dense output) ----
    out_shape = jax.ShapeDtypeStruct((m_pad, c_pad), out_dtype)
    if store_conv:
        out_flat = pl.pallas_call(
            _bn_relu_kernel,
            out_shape=out_shape,
            grid=(num_tiles,),
            in_specs=[row_spec, vec_spec, vec_spec],
            out_specs=row_spec,
            compiler_params=cp,
        )(conv_flat, scale, shift)
    else:
        out_flat = pl.pallas_call(
            _matmul_bn_relu_kernel,
            out_shape=out_shape,
            grid=(num_tiles,),
            in_specs=[p_spec, w_spec, vec_spec, vec_spec],
            out_specs=row_spec,
            compiler_params=cp,
        )(p, w_mat, scale, shift)

    # Slice off padding; NHWC avoids an extra full read+write of the output.
    out = out_flat[:m, :c_out].reshape(n, ho, wo, c_out)
    if out_layout == "NCHW":
        out = out.transpose(0, 3, 1, 2)
    return out


# ---------------------------------------------------------------------------
# Self-test
# ---------------------------------------------------------------------------

def _reference(x, weight, gamma, beta, stride, padding, dilation):
    conv = jax.lax.conv_general_dilated(
        x, weight, window_strides=(stride, stride),
        padding=[(padding, padding), (padding, padding)],
        rhs_dilation=(dilation, dilation),
        dimension_numbers=("NCHW", "OIHW", "NCHW"))
    mu = conv.mean(axis=(0, 2, 3), keepdims=True)
    var = conv.var(axis=(0, 2, 3), keepdims=True)
    return jnp.maximum((conv - mu) * jax.lax.rsqrt(var + BN_EPS)
                       * gamma[None, :, None, None] + beta[None, :, None, None], 0.0)


if __name__ == "__main__":
    key = jax.random.PRNGKey(0)
    kx, kw1, kw2, kg, kb = jax.random.split(key, 5)

    # Case 1: ConvBNReLU(4, 8, kernel_size=3, stride=1, padding=1, dilation=1)
    #   K_pad (128) >= C_pad (128) -> stored-conv path, two 'parallel' grid steps.
    N, C_IN, C_OUT, H, W = 2, 4, 8, 16, 16
    x = jax.random.normal(kx, (N, C_IN, H, W), dtype=jnp.float32)
    w1 = 0.1 * jax.random.normal(kw1, (C_OUT, C_IN, 3, 3), dtype=jnp.float32)
    g1 = jnp.ones((C_OUT,), jnp.float32)            # PyTorch BN init
    b1 = jnp.zeros((C_OUT,), jnp.float32)
    out1 = conv_bn_relu(x, w1, g1, b1, stride=1, padding=1, dilation=1)
    out1 = jax.block_until_ready(out1)
    assert out1.shape == (N, C_OUT, H, W)
    ref1 = _reference(x, w1, g1, b1, 1, 1, 1)
    err1 = float(jnp.max(jnp.abs(out1 - ref1)))
    assert err1 < 5e-2, f"case1 max abs error {err1}"   # loose tol: bf16 MXU inputs/intermediate

    # Case 2: ConvBNReLU(4, 192, kernel_size=1, stride=1, padding=0, dilation=1)
    #   K_pad (128) < C_pad (256) -> matmul-recompute path.
    C_OUT2 = 192
    w2 = 0.1 * jax.random.normal(kw2, (C_OUT2, C_IN, 1, 1), dtype=jnp.float32)
    g2 = 1.0 + 0.1 * jax.random.normal(kg, (C_OUT2,), dtype=jnp.float32)
    b2 = 0.1 * jax.random.normal(kb, (C_OUT2,), dtype=jnp.float32)
    out2 = conv_bn_relu(x, w2, g2, b2, stride=1, padding=0, dilation=1)
    out2 = jax.block_until_ready(out2)
    assert out2.shape == (N, C_OUT2, H, W)
    ref2 = _reference(x, w2, g2, b2, 1, 0, 1)
    err2 = float(jnp.max(jnp.abs(out2 - ref2)))
    assert err2 < 5e-2, f"case2 max abs error {err2}"

    print("KERNEL_OK")
</pallas_src>

<mosaic_0001>
module attributes {stable_mosaic.version = 11 : i64} {
  func.func @_conv_stats_store_kernel(%arg0: i32, %arg1: memref<256x128xbf16, #tpu.memory_space<vmem>>, %arg2: memref<128x128xbf16, #tpu.memory_space<vmem>>, %arg3: memref<256x128xbf16, #tpu.memory_space<vmem>>, %arg4: memref<1x8x128xf32, #tpu.memory_space<vmem>>) attributes {dimension_semantics = [#tpu.dimension_semantics<parallel>], iteration_bounds = array<i64: 2>, scalar_prefetch = 0 : i64, scratch_operands = 0 : i64, tpu.core_type = #tpu.core_type<tc>, window_params = [{transform_indices = @transform_0, window_bounds = array<i64: 256, 128>}, {pipeline_mode = #tpu.pipeline_mode<synchronous>, transform_indices = @transform_1, window_bounds = array<i64: 128, 128>}, {transform_indices = @transform_2, window_bounds = array<i64: 256, 128>}, {transform_indices = @transform_3, window_bounds = array<i64: 1, 8, 128>}]} {
    %c0 = arith.constant 0 : index
    %c0_0 = arith.constant 0 : index
    %0 = vector.load %arg1[%c0, %c0_0] : memref<256x128xbf16, #tpu.memory_space<vmem>>, vector<256x128xbf16>
    %c0_1 = arith.constant 0 : index
    %c0_2 = arith.constant 0 : index
    %1 = vector.load %arg2[%c0_1, %c0_2] : memref<128x128xbf16, #tpu.memory_space<vmem>>, vector<128x128xbf16>
    %cst = arith.constant dense<0.000000e+00> : vector<256x128xf32>
    %2 = tpu.matmul %0, %1, %cst {dimension_numbers = #tpu.dot_dimension_numbers<[1], [0], [0], [1], [0, 0, 1, 1], [], []>} : vector<256x128xbf16>, vector<128x128xbf16>, vector<256x128xf32> -> vector<256x128xf32>
    %3 = arith.truncf %2 : vector<256x128xf32> to vector<256x128xbf16>
    %c0_3 = arith.constant 0 : index
    %c0_4 = arith.constant 0 : index
    %4 = vector.load %arg3[%c0_3, %c0_4] : memref<256x128xbf16, #tpu.memory_space<vmem>>, vector<256x128xbf16>
    tpu.vector_store %arg3[%c0_3, %c0_4], %3 {strides = array<i32>} : memref<256x128xbf16, #tpu.memory_space<vmem>>, vector<256x128xbf16>,
    %cst_5 = arith.constant dense<0.000000e+00> : vector<128xf32>
    %5 = vector.multi_reduction <add>, %2, %cst_5 [0] : vector<256x128xf32> to vector<128xf32>
    %6 = vector.shape_cast %5 : vector<128xf32> to vector<1x128xf32>
    %c256_i32 = arith.constant 256 : i32
    %7 = arith.muli %arg0, %c256_i32 : i32
    %c512_i32 = arith.constant 512 : i32
    %8 = arith.subi %c512_i32, %7 : i32
    %c256_i32_6 = arith.constant 256 : i32
    %9 = arith.minsi %8, %c256_i32_6 : i32
    %c1_i32 = arith.constant 1 : i32
    %10 = arith.maxsi %9, %c1_i32 : i32
    %11 = arith.sitofp %10 : i32 to f32
    %12 = tpu.iota {dimensions = array<i32: 0>} : vector<256x1xi32>
    %c256_i32_7 = arith.constant 256 : i32
    %13 = arith.muli %arg0, %c256_i32_7 : i32
    %14 = vector.broadcast %13 : i32 to vector<256x1xi32>
    %15 = arith.addi %12, %14 : vector<256x1xi32>
    %c512_i32_8 = arith.constant 512 : i32
    %16 = vector.broadcast %c512_i32_8 : i32 to vector<256x1xi32>
    %17 = arith.cmpi slt, %15, %16 : vector<256x1xi32>
    %18 = vector.broadcast %11 : f32 to vector<1x128xf32>
    %19 = arith.divf %6, %18 : vector<1x128xf32>
    %20 = vector.broadcast %19 : vector<1x128xf32> to vector<256x128xf32>
    %21 = arith.subf %2, %20 : vector<256x128xf32>
    %cst_9 = arith.constant 0.000000e+00 : f32
    %22 = vector.shape_cast %17 : vector<256x1xi1> to vector<256x1xi1>
    %23 = vector.broadcast %22 : vector<256x1xi1> to vector<256x128xi1>
    %24 = vector.broadcast %cst_9 : f32 to vector<256x128xf32>
    %25 = arith.select %23, %21, %24 : vector<256x128xi1>, vector<256x128xf32>
    %26 = arith.mulf %25, %25 : vector<256x128xf32>
    %cst_10 = arith.constant dense<0.000000e+00> : vector<128xf32>
    %27 = vector.multi_reduction <add>, %26, %cst_10 [0] : vector<256x128xf32> to vector<128xf32>
    %28 = vector.shape_cast %27 : vector<128xf32> to vector<1x128xf32>
    %29 = tpu.iota {dimensions = array<i32: 0>} : vector<8x128xi32>
    %c0_i32 = arith.constant 0 : i32
    %30 = vector.broadcast %c0_i32 : i32 to vector<8x128xi32>
    %31 = arith.cmpi eq, %29, %30 : vector<8x128xi32>
    %cst_11 = arith.constant 0.000000e+00 : f32
    %32 = vector.shape_cast %6 : vector<1x128xf32> to vector<1x128xf32>
    %33 = vector.broadcast %32 : vector<1x128xf32> to vector<8x128xf32>
    %34 = vector.broadcast %cst_11 : f32 to vector<8x128xf32>
    %35 = arith.select %31, %33, %34 : vector<8x128xi1>, vector<8x128xf32>
    %c1_i32_12 = arith.constant 1 : i32
    %36 = vector.broadcast %c1_i32_12 : i32 to vector<8x128xi32>
    %37 = arith.cmpi eq, %29, %36 : vector<8x128xi32>
    %cst_13 = arith.constant 0.000000e+00 : f32
    %38 = vector.shape_cast %28 : vector<1x128xf32> to vector<1x128xf32>
    %39 = vector.broadcast %38 : vector<1x128xf32> to vector<8x128xf32>
    %40 = vector.broadcast %cst_13 : f32 to vector<8x128xf32>
    %41 = arith.select %37, %39, %40 : vector<8x128xi1>, vector<8x128xf32>
    %42 = arith.addf %35, %41 : vector<8x128xf32>
    %43 = vector.shape_cast %42 : vector<8x128xf32> to vector<1x8x128xf32>
    %c0_14 = arith.constant 0 : index
    %c0_15 = arith.constant 0 : index
    %c0_16 = arith.constant 0 : index
    %44 = vector.load %arg4[%c0_14, %c0_15, %c0_16] : memref<1x8x128xf32, #tpu.memory_space<vmem>>, vector<1x8x128xf32>
    tpu.vector_store %arg4[%c0_14, %c0_15, %c0_16], %43 {strides = array<i32>} : memref<1x8x128xf32, #tpu.memory_space<vmem>>, vector<1x8x128xf32>,
    return
  }
  func.func @transform_0(%arg0: i32) -> (i32, i32) {
    %c0_i32 = arith.constant 0 : i32
    %c0_i32_0 = arith.constant 0 : i32
    return %arg0, %c0_i32 : i32, i32
  }
  func.func @transform_1(%arg0: i32) -> (i32, i32) {
    %c0_i32 = arith.constant 0 : i32
    %c0_i32_0 = arith.constant 0 : i32
    %c0_i32_1 = arith.constant 0 : i32
    return %c0_i32, %c0_i32_0 : i32, i32
  }
  func.func @transform_2(%arg0: i32) -> (i32, i32) {
    %c0_i32 = arith.constant 0 : i32
    %c0_i32_0 = arith.constant 0 : i32
    return %arg0, %c0_i32 : i32, i32
  }
  func.func @transform_3(%arg0: i32) -> (i32, i32, i32) {
    %c0_i32 = arith.constant 0 : i32
    %c0_i32_0 = arith.constant 0 : i32
    %c0_i32_1 = arith.constant 0 : i32
    return %arg0, %c0_i32, %c0_i32_0 : i32, i32, i32
  }
}

module attributes {stable_mosaic.version = 11 : i64} {
  func.func @_bn_relu_kernel(%arg0: i32, %arg1: memref<256x128xbf16, #tpu.memory_space<vmem>>, %arg2: memref<1x128xf32, #tpu.memory_space<vmem>>, %arg3: memref<1x128xf32, #tpu.memory_space<vmem>>, %arg4: memref<256x128xf32, #tpu.memory_space<vmem>>) attributes {dimension_semantics = [#tpu.dimension_semantics<parallel>], iteration_bounds = array<i64: 2>, scalar_prefetch = 0 : i64, scratch_operands = 0 : i64, tpu.core_type = #tpu.core_type<tc>, window_params = [{transform_indices = @transform_0, window_bounds = array<i64: 256, 128>}, {pipeline_mode = #tpu.pipeline_mode<synchronous>, transform_indices = @transform_1, window_bounds = array<i64: 1, 128>}, {pipeline_mode = #tpu.pipeline_mode<synchronous>, transform_indices = @transform_2, window_bounds = array<i64: 1, 128>}, {transform_indices = @transform_3, window_bounds = array<i64: 256, 128>}]} {
    %c0 = arith.constant 0 : index
    %c0_0 = arith.constant 0 : index
    %0 = vector.load %arg1[%c0, %c0_0] : memref<256x128xbf16, #tpu.memory_space<vmem>>, vector<256x128xbf16>
    %1 = arith.extf %0 : vector<256x128xbf16> to vector<256x128xf32>
    %c0_1 = arith.constant 0 : index
    %c0_2 = arith.constant 0 : index
    %2 = vector.load %arg2[%c0_1, %c0_2] : memref<1x128xf32, #tpu.memory_space<vmem>>, vector<1x128xf32>
    %3 = vector.broadcast %2 : vector<1x128xf32> to vector<256x128xf32>
    %4 = arith.mulf %1, %3 : vector<256x128xf32>
    %c0_3 = arith.constant 0 : index
    %c0_4 = arith.constant 0 : index
    %5 = vector.load %arg3[%c0_3, %c0_4] : memref<1x128xf32, #tpu.memory_space<vmem>>, vector<1x128xf32>
    %6 = vector.broadcast %5 : vector<1x128xf32> to vector<256x128xf32>
    %7 = arith.addf %4, %6 : vector<256x128xf32>
    %cst = arith.constant 0.000000e+00 : f32
    %8 = vector.broadcast %cst : f32 to vector<256x128xf32>
    %9 = arith.maximumf %7, %8 : vector<256x128xf32>
    %c0_5 = arith.constant 0 : index
    %c0_6 = arith.constant 0 : index
    %10 = vector.load %arg4[%c0_5, %c0_6] : memref<256x128xf32, #tpu.memory_space<vmem>>, vector<256x128xf32>
    tpu.vector_store %arg4[%c0_5, %c0_6], %9 {strides = array<i32>} : memref<256x128xf32, #tpu.memory_space<vmem>>, vector<256x128xf32>,
    return
  }
  func.func @transform_0(%arg0: i32) -> (i32, i32) {
    %c0_i32 = arith.constant 0 : i32
    %c0_i32_0 = arith.constant 0 : i32
    return %arg0, %c0_i32 : i32, i32
  }
  func.func @transform_1(%arg0: i32) -> (i32, i32) {
    %c0_i32 = arith.constant 0 : i32
    %c0_i32_0 = arith.constant 0 : i32
    %c0_i32_1 = arith.constant 0 : i32
    return %c0_i32, %c0_i32_0 : i32, i32
  }
  func.func @transform_2(%arg0: i32) -> (i32, i32) {
    %c0_i32 = arith.constant 0 : i32
    %c0_i32_0 = arith.constant 0 : i32
    %c0_i32_1 = arith.constant 0 : i32
    return %c0_i32, %c0_i32_0 : i32, i32
  }
  func.func @transform_3(%arg0: i32) -> (i32, i32) {
    %c0_i32 = arith.constant 0 : i32
    %c0_i32_0 = arith.constant 0 : i32
    return %arg0, %c0_i32 : i32, i32
  }
}

</mosaic_0001>

<bundles_post_ra>
// kernel: conv_bn_relu.3
= control target key start
LH: loop header
LB: loop body
LE: loop exit
PB: predicated region body
PF: predicated region fallthrough
CT: control target
= control target key end

     0   :  { %s564_s12 = smov 0   ;;  %s711_s0 = inlined_call_operand.vmem [shape: bf16[512,128], index: 0, kind: input, shape index: {}]   ;;  %s712_s1 = inlined_call_operand.vmem [shape: f32[1,128], index: 1, kind: input, shape index: {}]   ;;  %s713_s2 = inlined_call_operand.vmem [shape: f32[1,128], index: 2, kind: input, shape index: {}]   ;;  %s714_s3 = inlined_call_operand.vmem [shape: f32[512,128], index: 3, kind: output, shape index: {}]  }
   0x1 LB: > { %s436_s13 = sadd.s32 4294967295, %s542_s12   ;;  %p440_p0 = scmp.ge.s32.totalorder %s542_s12, 1  ;;  %s542_s12 = sphi %s564_s12, %s13_s12  }
   0x2   : > { %p138_p1 = scmp.lt.s32.totalorder %s542_s12, 3 }
   0x4   : > { %p139_p2 = pnand %p440_p0, %p138_p1 }
   0x5   : > { %s441_s14 = sshll.u32 (!%p139_p2), %s436_s13, 5  ;;  %v583_v0 = vld [vmem:[%s712_s1] ss:$0 sm:$0xff] (!%p139_p2) }
   0x6   : > { %142 = sbr.rel (%p139_p2) target bundleno = 53 (0x35), region = 32  ;;  %p163_p3 = scmp.lt.s32.totalorder (!%p139_p2), %s441_s14, 63  ;;  %v592_v9 = vld [vmem:[%s713_s2] ss:$0 sm:$0xff] (!%p139_p2) }
   0xd   : > { %s716_s14 = smov (!%p163_p3, %s441_s14), 63 }
   0xe   : > { %s442_s15 = sshll.u32 %s716_s14, 2  ;;  %s444_s23 = sshll.u32 %s716_s14, 3 }
   0xf   : > { %s578_s18 = scalar_lea.vmem %s711_s0, %s442_s15  ;;  %s610_s26 = scalar_lea.vmem %s714_s3, %s444_s23 }
  0x10   : > { %v450_v1 = vld [vmem:[%s578_s18] sm:$0xff]   ;;  %v513_v2 = vld [vmem:[%s578_s18 + $0x8] sm:$0xff]   ;;  %v514_v3 = vld [vmem:[%s578_s18 + $0x10] sm:$0xff]  }
  0x11   : > { %v451_v4 = vunpack.c.l.bf16 %v450_v1  ;;  %v452_v5 = vunpack.c.h.bf16 %v450_v1  ;;  %v455_v6 = vunpack.c.l.bf16 %v513_v2  ;;  %v456_v7 = vunpack.c.h.bf16 %v513_v2  ;;  %v515_v8 = vld [vmem:[%s578_s18 + $0x18] sm:$0xff]   ;;  %v516_v30 = vld [vmem:[%s578_s18 + $0x20] sm:$0xff]   ;;  %v517_v31 = vld [vmem:[%s578_s18 + $0x28] sm:$0xff]  }
  0x12   : > { %v459_v10 = vunpack.c.l.bf16 %v514_v3  ;;  %v460_v11 = vunpack.c.h.bf16 %v514_v3  ;;  %v463_v12 = vunpack.c.l.bf16 %v515_v8  ;;  %v464_v13 = vunpack.c.h.bf16 %v515_v8  ;;  %v518_v36 = vld [vmem:[%s578_s18 + $0x30] sm:$0xff]   ;;  %v519_v37 = vld [vmem:[%s578_s18 + $0x38] sm:$0xff]   ;;  %v520_v3 = vld [vmem:[%s578_s18 + $0x40] sm:$0xff]  }
  0x13   : > { %v245_v14 = vmul.f32 %v451_v4, %v583_v0  ;;  %v246_v15 = vmul.f32 %v452_v5, %v583_v0  ;;  %v247_v16 = vmul.f32 %v455_v6, %v583_v0  ;;  %v248_v17 = vmul.f32 %v456_v7, %v583_v0  ;;  %v521_v4 = vld [vmem:[%s578_s18 + $0x48] sm:$0xff]  }
  0x14   : > { %v249_v18 = vmul.f32 %v459_v10, %v583_v0  ;;  %v250_v19 = vmul.f32 %v460_v11, %v583_v0  ;;  %v251_v20 = vmul.f32 %v463_v12, %v583_v0  ;;  %v252_v21 = vmul.f32 %v464_v13, %v583_v0  ;;  %v522_v10 = vld [vmem:[%s578_s18 + $0x50] sm:$0xff]   ;;  %v523_v11 = vld [vmem:[%s578_s18 + $0x58] sm:$0xff]  }
  0x15   : > { %v284_v22 = vadd.f32 %v592_v9, %v245_v14  ;;  %v285_v23 = vadd.f32 %v592_v9, %v246_v15  ;;  %v286_v24 = vadd.f32 %v592_v9, %v247_v16  ;;  %v287_v25 = vadd.f32 %v592_v9, %v248_v17 }
  0x16   : > { %v288_v26 = vadd.f32 %v592_v9, %v249_v18  ;;  %v289_v27 = vadd.f32 %v592_v9, %v250_v19  ;;  %v290_v28 = vadd.f32 %v592_v9, %v251_v20  ;;  %v291_v29 = vadd.f32 %v592_v9, %v252_v21 }
  0x17   : > { %v316_v32 = vmax.f32 %v284_v22, 0.0  ;;  %v317_v33 = vmax.f32 %v285_v23, 0.0  ;;  %v318_v34 = vmax.f32 %v286_v24, 0.0  ;;  %v319_v35 = vmax.f32 %v287_v25, 0.0 }
  0x18   : > { %v320_v38 = vmax.f32 %v288_v26, 0.0  ;;  %v321_v39 = vmax.f32 %v289_v27, 0.0  ;;  %v322_v40 = vmax.f32 %v290_v28, 0.0  ;;  %v323_v41 = vmax.f32 %v291_v29, 0.0 }
  0x19   : > { %348 = vst [vmem:[%s610_s26] sm:$0xff] %v316_v32  ;;  %349 = vst [vmem:[%s610_s26 + $0x8] sm:$0xff] %v317_v33  ;;  %v467_v42 = vunpack.c.l.bf16 %v516_v30  ;;  %v468_v43 = vunpack.c.h.bf16 %v516_v30  ;;  %v471_v44 = vunpack.c.l.bf16 %v517_v31  ;;  %v472_v45 = vunpack.c.h.bf16 %v517_v31 }
  0x1a   : > { %350 = vst [vmem:[%s610_s26 + $0x10] sm:$0xff] %v318_v34  ;;  %351 = vst [vmem:[%s610_s26 + $0x18] sm:$0xff] %v319_v35  ;;  %v475_v46 = vunpack.c.l.bf16 %v518_v36  ;;  %v476_v47 = vunpack.c.h.bf16 %v518_v36  ;;  %v479_v48 = vunpack.c.l.bf16 %v519_v37  ;;  %v480_v49 = vunpack.c.h.bf16 %v519_v37 }
  0x1b   : > { %352 = vst [vmem:[%s610_s26 + $0x20] sm:$0xff] %v320_v38  ;;  %353 = vst [vmem:[%s610_s26 + $0x28] sm:$0xff] %v321_v39  ;;  %v253_v50 = vmul.f32 %v467_v42, %v583_v0  ;;  %v254_v51 = vmul.f32 %v468_v43, %v583_v0  ;;  %v255_v52 = vmul.f32 %v471_v44, %v583_v0  ;;  %v483_v16 = vunpack.c.l.bf16 %v520_v3 }
  0x1c   : > { %354 = vst [vmem:[%s610_s26 + $0x30] sm:$0xff] %v322_v40  ;;  %355 = vst [vmem:[%s610_s26 + $0x38] sm:$0xff] %v323_v41  ;;  %v256_v53 = vmul.f32 %v472_v45, %v583_v0  ;;  %v257_v54 = vmul.f32 %v475_v46, %v583_v0  ;;  %v258_v55 = vmul.f32 %v476_v47, %v583_v0  ;;  %v484_v17 = vunpack.c.h.bf16 %v520_v3  ;;  %v524_v40 = vld [vmem:[%s578_s18 + $0x60] sm:$0xff]   ;;  %v525_v41 = vld [vmem:[%s578_s18 + $0x68] sm:$0xff]  }
  0x1d   : > { %v259_v56 = vmul.f32 %v479_v48, %v583_v0  ;;  %v260_v57 = vmul.f32 %v480_v49, %v583_v0  ;;  %v292_v58 = vadd.f32 %v592_v9, %v253_v50  ;;  %v293_v59 = vadd.f32 %v592_v9, %v254_v51  ;;  %v526_v46 = vld [vmem:[%s578_s18 + $0x70] sm:$0xff]   ;;  %v527_v47 = vld [vmem:[%s578_s18 + $0x78] sm:$0xff]  }
  0x1e   : > { %v294_v60 = vadd.f32 %v592_v9, %v255_v52  ;;  %v295_v61 = vadd.f32 %v592_v9, %v256_v53  ;;  %v296_v62 = vadd.f32 %v592_v9, %v257_v54  ;;  %v297_v63 = vadd.f32 %v592_v9, %v258_v55 }
  0x1f   : > { %v298_v1 = vadd.f32 %v592_v9, %v259_v56  ;;  %v299_v2 = vadd.f32 %v592_v9, %v260_v57  ;;  %v324_v5 = vmax.f32 %v292_v58, 0.0  ;;  %v325_v6 = vmax.f32 %v293_v59, 0.0 }
  0x20   : > { %v326_v7 = vmax.f32 %v294_v60, 0.0  ;;  %v327_v8 = vmax.f32 %v295_v61, 0.0  ;;  %v328_v12 = vmax.f32 %v296_v62, 0.0  ;;  %v329_v13 = vmax.f32 %v297_v63, 0.0 }
  0x21   : > { %v330_v14 = vmax.f32 %v298_v1, 0.0  ;;  %v331_v15 = vmax.f32 %v299_v2, 0.0  ;;  %356 = vst [vmem:[%s610_s26 + $0x40] sm:$0xff] %v324_v5  ;;  %357 = vst [vmem:[%s610_s26 + $0x48] sm:$0xff] %v325_v6  ;;  %v487_v18 = vunpack.c.l.bf16 %v521_v4  ;;  %v488_v19 = vunpack.c.h.bf16 %v521_v4 }
  0x22   : > { %358 = vst [vmem:[%s610_s26 + $0x50] sm:$0xff] %v326_v7  ;;  %359 = vst [vmem:[%s610_s26 + $0x58] sm:$0xff] %v327_v8  ;;  %v491_v20 = vunpack.c.l.bf16 %v522_v10  ;;  %v492_v21 = vunpack.c.h.bf16 %v522_v10  ;;  %v495_v22 = vunpack.c.l.bf16 %v523_v11  ;;  %v496_v23 = vunpack.c.h.bf16 %v523_v11 }
  0x23   : > { %360 = vst [vmem:[%s610_s26 + $0x60] sm:$0xff] %v328_v12  ;;  %361 = vst [vmem:[%s610_s26 + $0x68] sm:$0xff] %v329_v13  ;;  %v261_v24 = vmul.f32 %v483_v16, %v583_v0  ;;  %v262_v25 = vmul.f32 %v484_v17, %v583_v0  ;;  %v263_v26 = vmul.f32 %v487_v18, %v583_v0  ;;  %v499_v52 = vunpack.c.l.bf16 %v524_v40 }
  0x24   : > { %362 = vst [vmem:[%s610_s26 + $0x70] sm:$0xff] %v330_v14  ;;  %363 = vst [vmem:[%s610_s26 + $0x78] sm:$0xff] %v331_v15  ;;  %v264_v27 = vmul.f32 %v488_v19, %v583_v0  ;;  %v265_v28 = vmul.f32 %v491_v20, %v583_v0  ;;  %v266_v29 = vmul.f32 %v492_v21, %v583_v0  ;;  %v500_v53 = vunpack.c.h.bf16 %v524_v40 }
  0x25   : > { %v267_v30 = vmul.f32 %v495_v22, %v583_v0  ;;  %v268_v31 = vmul.f32 %v496_v23, %v583_v0  ;;  %v300_v32 = vadd.f32 %v592_v9, %v261_v24  ;;  %v301_v33 = vadd.f32 %v592_v9, %v262_v25 }
  0x26   : > { %v302_v34 = vadd.f32 %v592_v9, %v263_v26  ;;  %v303_v35 = vadd.f32 %v592_v9, %v264_v27  ;;  %v304_v36 = vadd.f32 %v592_v9, %v265_v28  ;;  %v305_v37 = vadd.f32 %v592_v9, %v266_v29 }
  0x27   : > { %v306_v38 = vadd.f32 %v592_v9, %v267_v30  ;;  %v307_v39 = vadd.f32 %v592_v9, %v268_v31  ;;  %v332_v42 = vmax.f32 %v300_v32, 0.0  ;;  %v333_v43 = vmax.f32 %v301_v33, 0.0 }
  0x28   : > { %v334_v44 = vmax.f32 %v302_v34, 0.0  ;;  %v335_v45 = vmax.f32 %v303_v35, 0.0  ;;  %v336_v48 = vmax.f32 %v304_v36, 0.0  ;;  %v337_v49 = vmax.f32 %v305_v37, 0.0 }
  0x29   : > { %v338_v50 = vmax.f32 %v306_v38, 0.0  ;;  %v339_v51 = vmax.f32 %v307_v39, 0.0  ;;  %364 = vst [vmem:[%s610_s26 + $0x80] sm:$0xff] %v332_v42  ;;  %365 = vst [vmem:[%s610_s26 + $0x88] sm:$0xff] %v333_v43  ;;  %v503_v54 = vunpack.c.l.bf16 %v525_v41  ;;  %v504_v55 = vunpack.c.h.bf16 %v525_v41 }
  0x2a   : > { %366 = vst [vmem:[%s610_s26 + $0x90] sm:$0xff] %v334_v44  ;;  %367 = vst [vmem:[%s610_s26 + $0x98] sm:$0xff] %v335_v45  ;;  %v507_v56 = vunpack.c.l.bf16 %v526_v46  ;;  %v508_v57 = vunpack.c.h.bf16 %v526_v46  ;;  %v511_v58 = vunpack.c.l.bf16 %v527_v47  ;;  %v512_v59 = vunpack.c.h.bf16 %v527_v47 }
  0x2b   : > { %368 = vst [vmem:[%s610_s26 + $0xa0] sm:$0xff] %v336_v48  ;;  %369 = vst [vmem:[%s610_s26 + $0xa8] sm:$0xff] %v337_v49  ;;  %v269_v60 = vmul.f32 %v499_v52, %v583_v0  ;;  %v270_v61 = vmul.f32 %v500_v53, %v583_v0  ;;  %v271_v62 = vmul.f32 %v503_v54, %v583_v0 }
  0x2c   : > { %370 = vst [vmem:[%s610_s26 + $0xb0] sm:$0xff] %v338_v50  ;;  %371 = vst [vmem:[%s610_s26 + $0xb8] sm:$0xff] %v339_v51  ;;  %v272_v63 = vmul.f32 %v504_v55, %v583_v0  ;;  %v273_v1 = vmul.f32 %v507_v56, %v583_v0  ;;  %v274_v2 = vmul.f32 %v508_v57, %v583_v0 }
  0x2d   : > { %v275_v3 = vmul.f32 %v511_v58, %v583_v0  ;;  %v276_v4 = vmul.f32 %v512_v59, %v583_v0  ;;  %v308_v5 = vadd.f32 %v592_v9, %v269_v60  ;;  %v309_v6 = vadd.f32 %v592_v9, %v270_v61 }
  0x2e   : > { %v310_v7 = vadd.f32 %v592_v9, %v271_v62  ;;  %v311_v8 = vadd.f32 %v592_v9, %v272_v63  ;;  %v312_v10 = vadd.f32 %v592_v9, %v273_v1  ;;  %v313_v11 = vadd.f32 %v592_v9, %v274_v2 }
  0x2f   : > { %v314_v0 = vadd.f32 %v592_v9, %v275_v3  ;;  %v315_v12 = vadd.f32 %v592_v9, %v276_v4  ;;  %v340_v13 = vmax.f32 %v308_v5, 0.0  ;;  %v341_v14 = vmax.f32 %v309_v6, 0.0 }
  0x30   : > { %v342_v15 = vmax.f32 %v310_v7, 0.0  ;;  %v343_v16 = vmax.f32 %v311_v8, 0.0  ;;  %v344_v17 = vmax.f32 %v312_v10, 0.0  ;;  %v345_v18 = vmax.f32 %v313_v11, 0.0 }
  0x31   : > { %v346_v19 = vmax.f32 %v314_v0, 0.0  ;;  %v347_v20 = vmax.f32 %v315_v12, 0.0  ;;  %372 = vst [vmem:[%s610_s26 + $0xc0] sm:$0xff] %v340_v13  ;;  %373 = vst [vmem:[%s610_s26 + $0xc8] sm:$0xff] %v341_v14 }
  0x32   : > { %374 = vst [vmem:[%s610_s26 + $0xd0] sm:$0xff] %v342_v15  ;;  %375 = vst [vmem:[%s610_s26 + $0xd8] sm:$0xff] %v343_v16 }
  0x33   : > { %376 = vst [vmem:[%s610_s26 + $0xe0] sm:$0xff] %v344_v17  ;;  %377 = vst [vmem:[%s610_s26 + $0xe8] sm:$0xff] %v345_v18 }
  0x34   : > { %378 = vst [vmem:[%s610_s26 + $0xf0] sm:$0xff] %v346_v19  ;;  %379 = vst [vmem:[%s610_s26 + $0xf8] sm:$0xff] %v347_v20 }
  0x35 PF: > { %s13_s12 = sadd.s32 1, %s542_s12  }
  0x36   : > { %p10_p4 = scmp.ge.s32.totalorder %s13_s12, 4  }
  0x38   :  { %12 = sbr.rel (!%p10_p4) target bundleno = 1 (0x1), region = 62 }

// kernel: conv_bn_relu.2
= control target key start
LH: loop header
LB: loop body
LE: loop exit
PB: predicated region body
PF: predicated region fallthrough
CT: control target
= control target key end

     0   :  { %s1487_s12 = smov 0   ;;  %s1933_s0 = inlined_call_operand.vmem [shape: bf16[512,128], index: 0, kind: input, shape index: {}]   ;;  %s1934_s1 = inlined_call_operand.vmem [shape: bf16[128,128], index: 1, kind: input, shape index: {}]   ;;  %s1935_s2 = inlined_call_operand.vmem [shape: bf16[512,128], index: 2, kind: output, shape index: {0}]   ;;  %s1936_s3 = inlined_call_operand.vmem [shape: f32[2,8,128], index: 3, kind: output, shape index: {1}]  }
   0x1 LB: > { %s1493_s13 = sadd.s32 4294967295, %s1465_s12   ;;  %p1138_p0 = scmp.ge.s32.totalorder %s1465_s12, 1  ;;  %s1465_s12 = sphi %s1487_s12, %s14_s12  }
   0x2   : > { %p141_p1 = scmp.lt.s32.totalorder %s1465_s12, 3 }
   0x4   : > { %p142_p2 = pnand %p1138_p0, %p141_p1 }
   0x5   : > { %v1433_v0 = vld [vmem:[%s1934_s1] sm:$0xff] (!%p142_p2)   ;;  %s1139_s16 = sshll.u32 (!%p142_p2), %s1493_s13, 5  ;;  %v1434_v1 = vld [vmem:[%s1934_s1 + $0x8] sm:$0xff] (!%p142_p2)   ;;  %v1435_v2 = vld [vmem:[%s1934_s1 + $0x10] sm:$0xff] (!%p142_p2)   ;;  %s1200_s11 = sshll.u32 (!%p142_p2), %s1493_s13, 8 }
   0x6   : > { %145 = sbr.rel (%p142_p2) target bundleno = 414 (0x19e), region = 28  ;;  %p170_p3 = scmp.lt.s32.totalorder (!%p142_p2), %s1139_s16, 63  ;;  %1361 = vmatprep.subr.bf16.mxu0 (!%p142_p2), %v1433_v0  ;;  %1409 = vmatprep.subr.bf16.mxu1 (!%p142_p2), %v1433_v0  ;;  %v1436_v3 = vld [vmem:[%s1934_s1 + $0x18] sm:$0xff] (!%p142_p2)   ;;  %v1437_v5 = vld [vmem:[%s1934_s1 + $0x20] sm:$0xff] (!%p142_p2)   ;;  %v1438_v6 = vld [vmem:[%s1934_s1 + $0x28] sm:$0xff] (!%p142_p2)  }
   0x7   : > { %1362 = vmatpush3.bf16.msra.mxu0 (!%p142_p2), %v1433_v0  ;;  %1417 = vmatpush3.bf16.msra.mxu1 (!%p142_p2), %v1433_v0  ;;  %v1439_v8 = vld [vmem:[%s1934_s1 + $0x30] sm:$0xff] (!%p142_p2)   ;;  %v1440_v9 = vld [vmem:[%s1934_s1 + $0x38] sm:$0xff] (!%p142_p2)   ;;  %s737_s14 = ssub.s32 (!%p142_p2), 512, %s1200_s11  ;;  %p181_p6 = scmp.lt.s32.totalorder (!%p142_p2), %s1493_s13, 1 }
   0x8   : > { %1363 = vmatprep.subr.bf16.mxu0 (!%p142_p2), %v1434_v1  ;;  %1410 = vmatprep.subr.bf16.mxu1 (!%p142_p2), %v1434_v1  ;;  %p738_p4 = scmp.lt.s32.totalorder (!%p142_p2), %s737_s14, 256  ;;  %p1201_p5 = scmp.gt.s32.totalorder (!%p142_p2), %s737_s14, 1 }
   0xb   : > { %1364 = vmatpush3.bf16.msra.mxu0 (!%p142_p2), %v1434_v1  ;;  %1418 = vmatpush3.bf16.msra.mxu1 (!%p142_p2), %v1434_v1 }
   0xc   : > { %1365 = vmatprep.subr.bf16.mxu0 (!%p142_p2), %v1435_v2  ;;  %1411 = vmatprep.subr.bf16.mxu1 (!%p142_p2), %v1435_v2 }
   0xd   : > { %s1954_s16 = smov (!%p170_p3, %s1139_s16), 63  ;;  %s1958_s13 = smov (!%p181_p6, %s1493_s13), 1 }
   0xe   : > { %s1140_s21 = sshll.u32 %s1954_s16, 2  ;;  %s1143_s17 = sshll.u32 %s1958_s13, 3 }
   0xf   : > { %s1515_s24 = scalar_lea.vmem %s1933_s0, %s1140_s21  ;;  %1366 = vmatpush3.bf16.msra.mxu0 %v1435_v2  ;;  %1419 = vmatpush3.bf16.msra.mxu1 %v1435_v2  ;;  %s1561_s10 = scalar_lea.vmem %s1935_s2, %s1140_s21 }
  0x10   : > { %v1441_v4 = vld [vmem:[%s1515_s24] sm:$0xff]   ;;  %1367 = vmatprep.subr.bf16.mxu0 %v1436_v3  ;;  %1412 = vmatprep.subr.bf16.mxu1 %v1436_v3  ;;  %v1442_v10 = vld [vmem:[%s1515_s24 + $0x8] sm:$0xff]   ;;  %v1443_v12 = vld [vmem:[%s1515_s24 + $0x10] sm:$0xff]   ;;  %s739_s15 = scalar_select %p738_p4, %s737_s14, 256 }
  0x11   : > { %1377 = vmatprep.mubr.bf16.mxu0 %v1441_v4  ;;  %v1449_v7 = vld [vmem:[%s1515_s24 + $0x40] sm:$0xff]   ;;  %v1450_v11 = vld [vmem:[%s1515_s24 + $0x48] sm:$0xff]   ;;  %v1451_v13 = vld [vmem:[%s1515_s24 + $0x50] sm:$0xff]   ;;  %s184_s20 = scalar_lea.vmem %s1936_s3, %s1143_s17 }
  0x12   : > { %1393 = vmatprep.mubr.bf16.mxu1 %v1449_v7  ;;  %v1444_v14 = vld [vmem:[%s1515_s24 + $0x18] sm:$0xff]   ;;  %v1445_v16 = vld [vmem:[%s1515_s24 + $0x20] sm:$0xff]   ;;  %v1446_v18 = vld [vmem:[%s1515_s24 + $0x28] sm:$0xff]   ;;  %s1956_s15 = smov (!%p1201_p5, %s739_s15), 1 }
  0x13   : > { %1368 = vmatpush3.bf16.msra.mxu0 %v1436_v3  ;;  %1420 = vmatpush3.bf16.msra.mxu1 %v1436_v3  ;;  %v1452_v15 = vld [vmem:[%s1515_s24 + $0x58] sm:$0xff]   ;;  %v1453_v17 = vld [vmem:[%s1515_s24 + $0x60] sm:$0xff]   ;;  %v1454_v19 = vld [vmem:[%s1515_s24 + $0x68] sm:$0xff]   ;;  %s742_s16 = scvt.s32.f32 %s1956_s15 }
  0x14   : > { %1369 = vmatprep.subr.bf16.mxu0 %v1437_v5  ;;  %1413 = vmatprep.subr.bf16.mxu1 %v1437_v5  ;;  %v1447_v20 = vld [vmem:[%s1515_s24 + $0x30] sm:$0xff]   ;;  %v1448_v22 = vld [vmem:[%s1515_s24 + $0x38] sm:$0xff]  }
  0x15   : > { %v1455_v21 = vld [vmem:[%s1515_s24 + $0x70] sm:$0xff]   ;;  %v1456_v23 = vld [vmem:[%s1515_s24 + $0x78] sm:$0xff]  }
  0x17   : > { %1370 = vmatpush3.bf16.msra.mxu0 %v1437_v5  ;;  %1421 = vmatpush3.bf16.msra.mxu1 %v1437_v5 }
  0x18   : > { %1371 = vmatprep.subr.bf16.mxu0 %v1438_v6  ;;  %1414 = vmatprep.subr.bf16.mxu1 %v1438_v6 }
  0x1b   : > { %1372 = vmatpush3.bf16.msra.mxu0 %v1438_v6  ;;  %1422 = vmatpush3.bf16.msra.mxu1 %v1438_v6 }
  0x1c   : > { %1373 = vmatprep.subr.bf16.mxu0 %v1439_v8  ;;  %1415 = vmatprep.subr.bf16.mxu1 %v1439_v8 }
  0x1f   : > { %1374 = vmatpush3.bf16.msra.mxu0 %v1439_v8  ;;  %1423 = vmatpush3.bf16.msra.mxu1 %v1439_v8 }
  0x20   : > { %1375 = vmatprep.subr.bf16.mxu0 %v1440_v9  ;;  %1416 = vmatprep.subr.bf16.mxu1 %v1440_v9 }
  0x23   : > { %1376 = vmatpush3.bf16.msra.mxu0 %v1440_v9  ;;  %1424 = vmatpush3.bf16.msra.mxu1 %v1440_v9 }
  0x26   : > { %1378 = vmatmul.mubr.bf16.vlgmr.msra.gmra.mrb[0].mxu0 %v1442_v10  ;;  %1394 = vmatmul.mubr.bf16.vlgmr.msra.gmra.mrb[0].mxu1 %v1450_v11 }
  0x27   : > { %1381 = vmatprep.mubr.bf16.mxu0 %v1443_v12  ;;  %1397 = vmatprep.mubr.bf16.mxu1 %v1451_v13 }
  0x2e   : > { %1382 = vmatmul.mubr.bf16.gmra.mrb[4].mxu0 %v1444_v14  ;;  %1398 = vmatmul.mubr.bf16.gmra.mrb[4].mxu1 %v1452_v15 }
  0x2f   : > { %1385 = vmatprep.mubr.bf16.mxu0 %v1445_v16  ;;  %1401 = vmatprep.mubr.bf16.mxu1 %v1453_v17 }
  0x36   : > { %1386 = vmatmul.mubr.bf16.gmra.mrb[8].mxu0 %v1446_v18  ;;  %1402 = vmatmul.mubr.bf16.gmra.mrb[8].mxu1 %v1454_v19 }
  0x37   : > { %1389 = vmatprep.mubr.bf16.mxu0 %v1447_v20  ;;  %1405 = vmatprep.mubr.bf16.mxu1 %v1455_v21 }
  0x3e   : > { %1390 = vmatmul.mubr.bf16.gmra.mrb[12].mxu0 %v1448_v22  ;;  %1406 = vmatmul.mubr.bf16.gmra.mrb[12].mxu1 %v1456_v23 }
  0xf9   : > { %v1548_v24 = vpop.f32.mrb[0].mxu0  ;;  %v1550_v25 = vpop.f32.mrb[0].mxu1 }
  0xfa   : > { %v1552_v26 = vpop.f32.mrb[1].mxu0  ;;  %v1554_v27 = vpop.f32.mrb[1].mxu1 }
  0xfb   : > { %v1563_v28 = vpop.f32.mrb[2].mxu0  ;;  %v1565_v29 = vpop.f32.mrb[2].mxu1 }
  0xfc   : > { %v1250_v30 = vpack.c.bf16 %v1563_v28, %v1548_v24  ;;  %v1569_v31 = vpop.f32.mrb[3].mxu0  ;;  %v1290_v32 = vpack.c.bf16 %v1565_v29, %v1550_v25  ;;  %v1573_v33 = vpop.f32.mrb[3].mxu1 }
  0xfd   : > { %v1245_v34 = vpack.c.bf16 %v1569_v31, %v1552_v26  ;;  %v699_v35 = vadd.f32 %v1569_v31, %v1552_v26  ;;  %v1285_v36 = vpack.c.bf16 %v1573_v33, %v1554_v27 }
  0xfe   : > { %1322 = vst [vmem:[%s1561_s10 + $0x8] sm:$0xff] %v1250_v30   ;;  %1330 = vst [vmem:[%s1561_s10 + $0x48] sm:$0xff] %v1290_v32  }
  0xff   : > { %1246 = vst [vmem:[%s1561_s10] sm:$0xff] %v1245_v34   ;;  %v700_v37 = vadd.f32 %v1548_v24, %v699_v35  ;;  %1329 = vst [vmem:[%s1561_s10 + $0x40] sm:$0xff] %v1285_v36  }
 0x101   : > { %v1586_v38 = vpop.f32.mrb[4].mxu0  ;;  %v701_v39 = vadd.f32 %v1563_v28, %v700_v37  ;;  %v1589_v40 = vpop.f32.mrb[4].mxu1 }
 0x102   : > { %v1591_v41 = vpop.f32.mrb[5].mxu0  ;;  %v1593_v42 = vpop.f32.mrb[5].mxu1 }
 0x103   : > { %v702_v43 = vadd.f32 %v701_v39, %v1591_v41  ;;  %v1596_v44 = vpop.f32.mrb[6].mxu0  ;;  %v1598_v45 = vpop.f32.mrb[6].mxu1 }
 0x104   : > { %v1260_v46 = vpack.c.bf16 %v1596_v44, %v1586_v38  ;;  %v1602_v47 = vpop.f32.mrb[7].mxu0  ;;  %v1300_v48 = vpack.c.bf16 %v1598_v45, %v1589_v40  ;;  %v1606_v49 = vpop.f32.mrb[7].mxu1 }
 0x105   : > { %v1255_v50 = vpack.c.bf16 %v1602_v47, %v1591_v41  ;;  %v703_v51 = vadd.f32 %v702_v43, %v1602_v47  ;;  %v1295_v52 = vpack.c.bf16 %v1606_v49, %v1593_v42 }
 0x106   : > { %1324 = vst [vmem:[%s1561_s10 + $0x18] sm:$0xff] %v1260_v46   ;;  %1332 = vst [vmem:[%s1561_s10 + $0x58] sm:$0xff] %v1300_v48  }
 0x107   : > { %1323 = vst [vmem:[%s1561_s10 + $0x10] sm:$0xff] %v1255_v50   ;;  %v704_v53 = vadd.f32 %v1586_v38, %v703_v51  ;;  %1331 = vst [vmem:[%s1561_s10 + $0x50] sm:$0xff] %v1295_v52  }
 0x109   : > { %v1618_v54 = vpop.f32.mrb[8].mxu0  ;;  %v705_v55 = vadd.f32 %v1596_v44, %v704_v53  ;;  %v1621_v56 = vpop.f32.mrb[8].mxu1 }
 0x10a   : > { %v1623_v57 = vpop.f32.mrb[9].mxu0  ;;  %v1625_v58 = vpop.f32.mrb[9].mxu1 }
 0x10b   : > { %v706_v59 = vadd.f32 %v705_v55, %v1623_v57  ;;  %v1628_v60 = vpop.f32.mrb[10].mxu0  ;;  %v1630_v61 = vpop.f32.mrb[10].mxu1  ;;  %v841_v55 = vstv %s742_s16 }
 0x10c   : > { %v1270_v62 = vpack.c.bf16 %v1628_v60, %v1618_v54  ;;  %v1634_v63 = vpop.f32.mrb[11].mxu0  ;;  %v1310_v0 = vpack.c.bf16 %v1630_v61, %v1621_v56  ;;  %v1638_v1 = vpop.f32.mrb[11].mxu1  ;;  %1457 = vrcp.f32 %v841_v55 }
 0x10d   : > { %v1265_v2 = vpack.c.bf16 %v1634_v63, %v1623_v57  ;;  %v707_v3 = vadd.f32 %v706_v59, %v1634_v63  ;;  %v1305_v4 = vpack.c.bf16 %v1638_v1, %v1625_v58 }
 0x10e   : > { %1326 = vst [vmem:[%s1561_s10 + $0x28] sm:$0xff] %v1270_v62   ;;  %1334 = vst [vmem:[%s1561_s10 + $0x68] sm:$0xff] %v1310_v0  }
 0x10f   : > { %1325 = vst [vmem:[%s1561_s10 + $0x20] sm:$0xff] %v1265_v2   ;;  %v708_v5 = vadd.f32 %v1618_v54, %v707_v3  ;;  %1333 = vst [vmem:[%s1561_s10 + $0x60] sm:$0xff] %v1305_v4   ;;  %v743_v3 = vlaneseq }
 0x111   : > { %v1650_v6 = vpop.f32.mrb[12].mxu0  ;;  %v709_v7 = vadd.f32 %v1628_v60, %v708_v5  ;;  %v1653_v8 = vpop.f32.mrb[12].mxu1 }
 0x112   : > { %v1655_v9 = vpop.f32.mrb[13].mxu0  ;;  %v1657_v10 = vpop.f32.mrb[13].mxu1 }
 0x113   : > { %v710_v11 = vadd.f32 %v709_v7, %v1655_v9  ;;  %v1660_v12 = vpop.f32.mrb[14].mxu0  ;;  %v1662_v13 = vpop.f32.mrb[14].mxu1 }
 0x114   : > { %v1280_v14 = vpack.c.bf16 %v1660_v12, %v1650_v6  ;;  %v1666_v15 = vpop.f32.mrb[15].mxu0  ;;  %v1320_v16 = vpack.c.bf16 %v1662_v13, %v1653_v8  ;;  %v1670_v17 = vpop.f32.mrb[15].mxu1 }
 0x115   : > { %v1275_v18 = vpack.c.bf16 %v1666_v15, %v1655_v9  ;;  %v711_v19 = vadd.f32 %v710_v11, %v1666_v15  ;;  %v1315_v20 = vpack.c.bf16 %v1670_v17, %v1657_v10  ;;  %v1702_v11 = vshrl.u32 %v743_v3, 7 }
 0x116   : > { %1328 = vst [vmem:[%s1561_s10 + $0x38] sm:$0xff] %v1280_v14   ;;  %1336 = vst [vmem:[%s1561_s10 + $0x78] sm:$0xff] %v1320_v16   ;;  %v1458_v7 = vpop.eup %1457 }
 0x117   : > { %1327 = vst [vmem:[%s1561_s10 + $0x30] sm:$0xff] %v1275_v18   ;;  %v712_v21 = vadd.f32 %v1650_v6, %v711_v19  ;;  %1335 = vst [vmem:[%s1561_s10 + $0x70] sm:$0xff] %v1315_v20   ;;  %v745_v18 = vadd.s32 8, %v1702_v11  ;;  %v1712_v19 = vstv %s1200_s11  ;;  %v748_v3 = vadd.s32 32, %v1702_v11 }
 0x119   : > { %v713_v22 = vadd.f32 %v1660_v12, %v712_v21 }
 0x11b   : > { %v714_v23 = vadd.f32 %v713_v22, %v1554_v27 }
 0x11d   : > { %v715_v30 = vadd.f32 %v714_v23, %v1573_v33 }
 0x11f   : > { %v716_v32 = vadd.f32 %v1550_v25, %v715_v30 }
 0x121   : > { %v717_v34 = vadd.f32 %v1565_v29, %v716_v32 }
 0x123   : > { %v718_v35 = vadd.f32 %v717_v34, %v1593_v42 }
 0x125   : > { %v719_v36 = vadd.f32 %v718_v35, %v1606_v49 }
 0x127   : > { %v720_v37 = vadd.f32 %v1589_v40, %v719_v36 }
 0x129   : > { %v721_v39 = vadd.f32 %v1598_v45, %v720_v37 }
 0x12b   : > { %v722_v43 = vadd.f32 %v721_v39, %v1625_v58 }
 0x12d   : > { %v723_v46 = vadd.f32 %v722_v43, %v1638_v1  ;;  %v754_v43 = vadd.s32 80, %v1702_v11 }
 0x12f   : > { %v724_v48 = vadd.f32 %v1621_v56, %v723_v46 }
 0x131   : > { %v725_v50 = vadd.f32 %v1630_v61, %v724_v48 }
 0x133   : > { %v726_v51 = vadd.f32 %v725_v50, %v1657_v10 }
 0x135   : > { %v727_v52 = vadd.f32 %v726_v51, %v1670_v17  ;;  %v781_v51 = vadd.s32 %v1712_v19, %v748_v3 }
 0x137   : > { %v728_v53 = vadd.f32 %v1653_v8, %v727_v52  ;;  %v750_v52 = vadd.s32 48, %v1702_v11  ;;  %vm813_vm4 = vcmp.lt.s32.totalorder %v781_v51, 512 }
 0x139   : > { %v729_v59 = vadd.f32 %v1662_v13, %v728_v53  ;;  %v783_v46 = vadd.s32 %v1712_v19, %v750_v52 }
 0x13b   : > { %v730_v62 = vrot.slane %v729_v59, 4  ;;  %vm815_vm6 = vcmp.lt.s32.totalorder %v783_v46, 512  ;;  %v787_v46 = vadd.s32 %v1712_v19, %v754_v43 }
 0x13d   : > { %v731_v0 = vadd.f32 %v730_v62, %v729_v59  ;;  %v746_v62 = vadd.s32 16, %v1702_v11  ;;  %v778_v59 = vadd.s32 %v1712_v19, %v745_v18  ;;  %v751_v18 = vadd.s32 56, %v1702_v11 }
 0x13e   : > { %vm819_vm10 = vcmp.lt.s32.totalorder %v787_v46, 512 }
 0x13f   : > { %v732_v2 = vrot.slane %v731_v0, 2  ;;  %v779_v55 = vadd.s32 %v1712_v19, %v746_v62  ;;  %vm810_vm1 = vcmp.lt.s32.totalorder %v778_v59, 512  ;;  %v752_v59 = vadd.s32 64, %v1702_v11 }
 0x141   : > { %v733_v4 = vadd.f32 %v732_v2, %v731_v0  ;;  %v777_v0 = vadd.s32 %v1712_v19, %v1702_v11  ;;  %v747_v2 = vadd.s32 24, %v1702_v11  ;;  %vm811_vm2 = vcmp.lt.s32.totalorder %v779_v55, 512 }
 0x143   : > { %v734_v5 = vrot.slane %v733_v4, 1  ;;  %vm809_vm0 = vcmp.lt.s32.totalorder %v777_v0, 512 }
 0x145   : > { %v1704_v14 = vadd.f32 %v734_v5, %v733_v4  ;;  %v749_v5 = vadd.s32 40, %v1702_v11  ;;  %v780_v4 = vadd.s32 %v1712_v19, %v747_v2  ;;  %v784_v2 = vadd.s32 %v1712_v19, %v751_v18 }
 0x147   : > { %v1707_v16 = vmul.f32 %v1458_v7, %v1704_v14  ;;  %v782_v50 = vadd.s32 %v1712_v19, %v749_v5  ;;  %vm812_vm3 = vcmp.lt.s32.totalorder %v780_v4, 512  ;;  %v785_v4 = vadd.s32 %v1712_v19, %v752_v59 }
 0x148   : > { %vm816_vm7 = vcmp.lt.s32.totalorder %v784_v2, 512 }
 0x149   : > { %v844_v20 = vsub.f32 %v1552_v26, %v1707_v16  ;;  %v845_v21 = vsub.f32 %v1569_v31, %v1707_v16  ;;  %v846_v22 = vsub.f32 %v1548_v24, %v1707_v16  ;;  %v847_v23 = vsub.f32 %v1563_v28, %v1707_v16 }
 0x14a   : > { %v848_v30 = vsub.f32 %v1591_v41, %v1707_v16  ;;  %v849_v32 = vsub.f32 %v1602_v47, %v1707_v16  ;;  %v850_v34 = vsub.f32 %v1586_v38, %v1707_v16  ;;  %v851_v26 = vsub.f32 %v1596_v44, %v1707_v16 }
 0x14b   : > { %v852_v31 = vsub.f32 %v1623_v57, %v1707_v16  ;;  %v853_v24 = vsub.f32 %v1634_v63, %v1707_v16  ;;  %v854_v28 = vsub.f32 %v1618_v54, %v1707_v16  ;;  %v855_v41 = vsub.f32 %v1628_v60, %v1707_v16 }
 0x14c   : > { %v856_v35 = vsub.f32 %v1655_v9, %v1707_v16  ;;  %v857_v36 = vsub.f32 %v1666_v15, %v1707_v16  ;;  %v858_v37 = vsub.f32 %v1650_v6, %v1707_v16  ;;  %v859_v39 = vsub.f32 %v1660_v12, %v1707_v16 }
 0x14d   : > { %v940_v7 = vsel %vm809_vm0, %v844_v20, 0.0  ;;  %v941_v53 = vsel %vm810_vm1, %v845_v21, 0.0  ;;  %v942_v0 = vsel %vm811_vm2, %v846_v22, 0.0  ;;  %v753_v20 = vadd.s32 72, %v1702_v11 }
 0x14e   : > { %v972_v48 = vmul.f32 %v940_v7, %v940_v7  ;;  %v973_v62 = vmul.f32 %v941_v53, %v941_v53  ;;  %v943_v21 = vsel %vm812_vm3, %v847_v23, 0.0  ;;  %vm814_vm5 = vcmp.lt.s32.totalorder %v782_v50, 512 }
 0x14f   : > { %v974_v55 = vmul.f32 %v942_v0, %v942_v0  ;;  %v944_v5 = vsel %vm813_vm4, %v848_v30, 0.0  ;;  %v975_v22 = vmul.f32 %v943_v21, %v943_v21  ;;  %v755_v7 = vadd.s32 88, %v1702_v11 }
 0x150   : > { %v1004_v3 = vadd.f32 %v973_v62, %v972_v48  ;;  %v945_v51 = vsel %vm814_vm5, %v849_v32, 0.0  ;;  %v786_v23 = vadd.s32 %v1712_v19, %v753_v20  ;;  %v976_v50 = vmul.f32 %v944_v5, %v944_v5 }
 0x151   : > { %v756_v48 = vadd.s32 96, %v1702_v11  ;;  %v946_v30 = vsel %vm815_vm6, %v850_v34, 0.0  ;;  %vm817_vm8 = vcmp.lt.s32.totalorder %v785_v4, 512  ;;  %v977_v18 = vmul.f32 %v945_v51, %v945_v51 }
 0x152   : > { %v1005_v53 = vadd.f32 %v1004_v3, %v974_v55  ;;  %v757_v0 = vadd.s32 104, %v1702_v11  ;;  %v947_v47 = vsel %vm816_vm7, %v851_v26, 0.0  ;;  %v788_v32 = vadd.s32 %v1712_v19, %v755_v7 }
 0x153   : > { %vm818_vm9 = vcmp.lt.s32.totalorder %v786_v23, 512  ;;  %v978_v59 = vmul.f32 %v946_v30, %v946_v30  ;;  %v758_v21 = vadd.s32 112, %v1702_v11  ;;  %v948_v38 = vsel %vm817_vm8, %v852_v31, 0.0 }
 0x154   : > { %v1006_v52 = vadd.f32 %v1005_v53, %v975_v22  ;;  %v789_v34 = vadd.s32 %v1712_v19, %v756_v48  ;;  %v979_v43 = vmul.f32 %v947_v47, %v947_v47  ;;  %v759_v55 = vadd.s32 120, %v1702_v11 }
 0x155   : > { %v949_v44 = vsel %vm818_vm9, %v853_v24, 0.0  ;;  %v790_v26 = vadd.s32 %v1712_v19, %v757_v0  ;;  %vm820_vm11 = vcmp.lt.s32.totalorder %v788_v32, 512  ;;  %v980_v3 = vmul.f32 %v948_v38, %v948_v38 }
 0x156   : > { %v1007_v62 = vadd.f32 %v1006_v52, %v976_v50  ;;  %v760_v4 = vadd.s32 128, %v1702_v11  ;;  %v950_v57 = vsel %vm819_vm10, %v854_v28, 0.0  ;;  %v791_v31 = vadd.s32 %v1712_v19, %v758_v21 }
 0x157   : > { %vm821_vm12 = vcmp.lt.s32.totalorder %v789_v34, 512  ;;  %v981_v22 = vmul.f32 %v949_v44, %v949_v44  ;;  %v761_v7 = vadd.s32 136, %v1702_v11  ;;  %v951_v63 = vsel %vm820_vm11, %v855_v41, 0.0 }
 0x158   : > { %v1008_v20 = vadd.f32 %v1007_v62, %v977_v18  ;;  %v792_v24 = vadd.s32 %v1712_v19, %v759_v55  ;;  %vm822_vm13 = vcmp.lt.s32.totalorder %v790_v26, 512  ;;  %v982_v51 = vmul.f32 %v950_v57, %v950_v57 }
 0x159   : > { %v762_v50 = vadd.s32 144, %v1702_v11  ;;  %v952_v54 = vsel %vm821_vm12, %v856_v35, 0.0  ;;  %v793_v28 = vadd.s32 %v1712_v19, %v760_v4  ;;  %vm823_vm14 = vcmp.lt.s32.totalorder %v791_v31, 512 }
 0x15a   : > { %v1009_v2 = vadd.f32 %v1008_v20, %v978_v59  ;;  %v983_v52 = vmul.f32 %v951_v63, %v951_v63  ;;  %v763_v30 = vadd.s32 152, %v1702_v11  ;;  %v953_v60 = vsel %vm822_vm13, %v857_v36, 0.0 }
 0x15b   : > { %v794_v41 = vadd.s32 %v1712_v19, %v761_v7  ;;  %vm824_vm15 = vcmp.lt.s32.totalorder %v792_v24, 512  ;;  %v984_v46 = vmul.f32 %v952_v54, %v952_v54  ;;  %v764_v62 = vadd.s32 160, %v1702_v11 }
 0x15c   : > { %v1010_v5 = vadd.f32 %v1009_v2, %v979_v43  ;;  %v954_v9 = vsel %vm823_vm14, %v858_v37, 0.0  ;;  %v795_v35 = vadd.s32 %v1712_v19, %v762_v50  ;;  %vm825_vm0 = vcmp.lt.s32.totalorder %v793_v28, 512 }
 0x15d   : > { %v985_v0 = vmul.f32 %v953_v60, %v953_v60  ;;  %v765_v32 = vadd.s32 168, %v1702_v11  ;;  %v955_v15 = vsel %vm824_vm15, %v859_v39, 0.0  ;;  %v796_v36 = vadd.s32 %v1712_v19, %v763_v30 }
 0x15e   : > { %v1011_v53 = vadd.f32 %v1010_v5, %v980_v3  ;;  %vm826_vm1 = vcmp.lt.s32.totalorder %v794_v41, 512  ;;  %v986_v59 = vmul.f32 %v954_v9, %v954_v9  ;;  %v766_v21 = vadd.s32 176, %v1702_v11 }
 0x15f   : > { %v1937_v6 = vsub.f32 %v1554_v27, %v1707_v16  ;;  %v797_v38 = vadd.s32 %v1712_v19, %v764_v62  ;;  %vm827_vm2 = vcmp.lt.s32.totalorder %v795_v35, 512  ;;  %v987_v34 = vmul.f32 %v955_v15, %v955_v15 }
 0x160   : > { %v1012_v23 = vadd.f32 %v1011_v53, %v981_v22  ;;  %v767_v2 = vadd.s32 184, %v1702_v11  ;;  %v1938_v12 = vsub.f32 %v1573_v33, %v1707_v16  ;;  %v798_v55 = vadd.s32 %v1712_v19, %v765_v32 }
 0x161   : > { %v956_v37 = vsel %vm825_vm0, %v1937_v6, 0.0  ;;  %vm828_vm3 = vcmp.lt.s32.totalorder %v796_v36, 512  ;;  %v768_v3 = vadd.s32 192, %v1702_v11  ;;  %v1939_v27 = vsub.f32 %v1550_v25, %v1707_v16 }
 0x162   : > { %v1013_v48 = vadd.f32 %v1012_v23, %v982_v51  ;;  %v957_v39 = vsel %vm826_vm1, %v1938_v12, 0.0  ;;  %v988_v44 = vmul.f32 %v956_v37, %v956_v37  ;;  %v799_v4 = vadd.s32 %v1712_v19, %v766_v21 }
 0x163   : > { %v958_v5 = vsel %vm827_vm2, %v1939_v27, 0.0  ;;  %vm829_vm4 = vcmp.lt.s32.totalorder %v797_v38, 512  ;;  %v989_v57 = vmul.f32 %v957_v39, %v957_v39  ;;  %v769_v22 = vadd.s32 200, %v1702_v11 }
 0x164   : > { %v1014_v18 = vadd.f32 %v1013_v48, %v983_v52  ;;  %v1940_v33 = vsub.f32 %v1565_v29, %v1707_v16  ;;  %v800_v7 = vadd.s32 %v1712_v19, %v767_v2  ;;  %vm830_vm5 = vcmp.lt.s32.totalorder %v798_v55, 512 }
 0x165   : > { %v990_v63 = vmul.f32 %v958_v5, %v958_v5  ;;  %v770_v51 = vadd.s32 208, %v1702_v11  ;;  %v1941_v25 = vsub.f32 %v1593_v42, %v1707_v16  ;;  %v801_v50 = vadd.s32 %v1712_v19, %v768_v3 }
 0x166   : > { %v1015_v47 = vadd.f32 %v1014_v18, %v984_v46  ;;  %v959_v53 = vsel %vm828_vm3, %v1940_v33, 0.0  ;;  %vm831_vm6 = vcmp.lt.s32.totalorder %v799_v4, 512  ;;  %v771_v52 = vadd.s32 216, %v1702_v11 }
 0x167   : > { %v960_v23 = vsel %vm829_vm4, %v1941_v25, 0.0  ;;  %v991_v54 = vmul.f32 %v959_v53, %v959_v53  ;;  %v1942_v29 = vsub.f32 %v1606_v49, %v1707_v16  ;;  %v802_v30 = vadd.s32 %v1712_v19, %v769_v22 }
 0x168   : > { %v1016_v20 = vadd.f32 %v1015_v47, %v985_v0  ;;  %vm832_vm7 = vcmp.lt.s32.totalorder %v800_v7, 512  ;;  %v992_v60 = vmul.f32 %v960_v23, %v960_v23  ;;  %v772_v46 = vadd.s32 224, %v1702_v11 }
 0x169   : > { %v961_v48 = vsel %vm830_vm5, %v1942_v29, 0.0  ;;  %v1943_v42 = vsub.f32 %v1589_v40, %v1707_v16  ;;  %v803_v62 = vadd.s32 %v1712_v19, %v770_v51  ;;  %vm833_vm8 = vcmp.lt.s32.totalorder %v801_v50, 512 }
 0x16a   : > { %v1017_v43 = vadd.f32 %v1016_v20, %v986_v59  ;;  %v993_v9 = vmul.f32 %v961_v48, %v961_v48  ;;  %v773_v0 = vadd.s32 232, %v1702_v11  ;;  %v1944_v49 = vsub.f32 %v1598_v45, %v1707_v16 }
 0x16b   : > { %v962_v18 = vsel %vm831_vm6, %v1943_v42, 0.0  ;;  %v804_v32 = vadd.s32 %v1712_v19, %v771_v52  ;;  %vm834_vm9 = vcmp.lt.s32.totalorder %v802_v30, 512  ;;  %v774_v59 = vadd.s32 240, %v1702_v11 }
 0x16c   : > { %v1018_v26 = vadd.f32 %v1017_v43, %v987_v34  ;;  %v963_v47 = vsel %vm832_vm7, %v1944_v49, 0.0  ;;  %v994_v15 = vmul.f32 %v962_v18, %v962_v18  ;;  %v1945_v40 = vsub.f32 %v1625_v58, %v1707_v16 }
 0x16d   : > { %v805_v21 = vadd.s32 %v1712_v19, %v772_v46  ;;  %vm835_vm10 = vcmp.lt.s32.totalorder %v803_v62, 512  ;;  %v995_v6 = vmul.f32 %v963_v47, %v963_v47  ;;  %v775_v38 = vadd.s32 248, %v1702_v11 }
 0x16e   : > { %v1019_v31 = vadd.f32 %v1018_v26, %v988_v44  ;;  %v964_v20 = vsel %vm833_vm8, %v1945_v40, 0.0  ;;  %v1946_v45 = vsub.f32 %v1638_v1, %v1707_v16  ;;  %v806_v43 = vadd.s32 %v1712_v19, %v773_v0 }
 0x16f   : > { %vm836_vm11 = vcmp.lt.s32.totalorder %v804_v32, 512  ;;  %v996_v2 = vmul.f32 %v964_v20, %v964_v20  ;;  %v1947_v58 = vsub.f32 %v1621_v56, %v1707_v16  ;;  %v807_v55 = vadd.s32 %v1712_v19, %v774_v59 }
 0x170   : > { %v1020_v24 = vadd.f32 %v1019_v31, %v989_v57  ;;  %v965_v34 = vsel %vm834_vm9, %v1946_v45, 0.0  ;;  %vm837_vm12 = vcmp.lt.s32.totalorder %v805_v21, 512  ;;  %v1948_v3 = vsub.f32 %v1630_v61, %v1707_v16 }
 0x171   : > { %v966_v39 = vsel %vm835_vm10, %v1947_v58, 0.0  ;;  %v997_v44 = vmul.f32 %v965_v34, %v965_v34  ;;  %v808_v1 = vadd.s32 %v1712_v19, %v775_v38  ;;  %vm838_vm13 = vcmp.lt.s32.totalorder %v806_v43, 512 }
 0x172   : > { %v1021_v28 = vadd.f32 %v1020_v24, %v990_v63  ;;  %v967_v27 = vsel %vm836_vm11, %v1948_v3, 0.0  ;;  %v998_v5 = vmul.f32 %v966_v39, %v966_v39  ;;  %v1949_v57 = vsub.f32 %v1657_v10, %v1707_v16 }
 0x173   : > { %vm839_vm14 = vcmp.lt.s32.totalorder %v807_v55, 512  ;;  %v999_v56 = vmul.f32 %v967_v27, %v967_v27  ;;  %v1950_v33 = vsub.f32 %v1670_v17, %v1707_v16  ;;  %vm840_vm15 = vcmp.lt.s32.totalorder %v808_v1, 512 }
 0x174   : > { %v1022_v41 = vadd.f32 %v1021_v28, %v991_v54  ;;  %v968_v31 = vsel %vm837_vm12, %v1949_v57, 0.0  ;;  %v1951_v19 = vsub.f32 %v1653_v8, %v1707_v16  ;;  %v1952_v10 = vsub.f32 %v1662_v13, %v1707_v16 }
 0x175   : > { %v969_v53 = vsel %vm838_vm13, %v1950_v33, 0.0  ;;  %v1000_v61 = vmul.f32 %v968_v31, %v968_v31  ;;  %vm1041_vm0 = vcmp.eq.s32.totalorder %v1702_v11, 0  ;;  %vm1043_vm1 = vcmp.eq.s32.totalorder %v1702_v11, 1 }
 0x176   : > { %v1023_v35 = vadd.f32 %v1022_v41, %v992_v60  ;;  %v970_v63 = vsel %vm839_vm14, %v1951_v19, 0.0  ;;  %v1001_v24 = vmul.f32 %v969_v53, %v969_v53  ;;  %v971_v25 = vsel %vm840_vm15, %v1952_v10, 0.0 }
 0x177   : > { %v1002_v23 = vmul.f32 %v970_v63, %v970_v63  ;;  %v1003_v54 = vmul.f32 %v971_v25, %v971_v25  ;;  %v1042_v13 = vsel %vm1041_vm0, %v1704_v14, 0.0 }
 0x178   : > { %v1024_v36 = vadd.f32 %v1023_v35, %v993_v9 }
 0x17a   : > { %v1025_v37 = vadd.f32 %v1024_v36, %v994_v15 }
 0x17c   : > { %v1026_v12 = vadd.f32 %v1025_v37, %v995_v6 }
 0x17e   : > { %v1027_v26 = vadd.f32 %v1026_v12, %v996_v2 }
 0x180   : > { %v1028_v4 = vadd.f32 %v1027_v26, %v997_v44 }
 0x182   : > { %v1029_v22 = vadd.f32 %v1028_v4, %v998_v5 }
 0x184   : > { %v1030_v7 = vadd.f32 %v1029_v22, %v999_v56 }
 0x186   : > { %v1031_v51 = vadd.f32 %v1030_v7, %v1000_v61 }
 0x188   : > { %v1032_v50 = vadd.f32 %v1031_v51, %v1001_v24 }
 0x18a   : > { %v1033_v28 = vadd.f32 %v1032_v50, %v1002_v23 }
 0x18c   : > { %v1034_v17 = vadd.f32 %v1033_v28, %v1003_v54 }
 0x18e   : > { %v1035_v52 = vrot.slane %v1034_v17, 4 }
 0x190   : > { %v1036_v29 = vadd.f32 %v1035_v52, %v1034_v17 }
 0x192   : > { %v1037_v48 = vrot.slane %v1036_v29, 2 }
 0x194   : > { %v1038_v30 = vadd.f32 %v1037_v48, %v1036_v29 }
 0x196   : > { %v1039_v60 = vrot.slane %v1038_v30, 1 }
 0x198   : > { %v1040_v8 = vadd.f32 %v1039_v60, %v1038_v30 }
 0x19a   : > { %v1044_v16 = vsel %vm1043_vm1, %v1040_v8, 0.0 }
 0x19b   : > { %v1045_v41 = vadd.f32 %v1044_v16, %v1042_v13 }
 0x19d   : > { %1046 = vst [vmem:[%s184_s20] sm:$0xff] %v1045_v41 }
 0x19e PF: > { %s14_s12 = sadd.s32 1, %s1465_s12  }
 0x19f   : > { %p11_p7 = scmp.ge.s32.totalorder %s14_s12, 4  }
 0x1a1   :  { %13 = sbr.rel (!%p11_p7) target bundleno = 1 (0x1), region = 70 }

</bundles_post_ra>
